<compile_context>
chip_gen: v7x
topology: tpu7x:2x2x1
jax: 0.10.0
libtpu: 0.0.40
codegen_flags: <defaults>
</compile_context>

<pallas_src>
import functools

import jax
import jax.numpy as jnp
from jax.experimental import pallas as pl
from jax.experimental.pallas import tpu as pltpu


def _rank_constrained_svd_kernel(s_ref, m_ref, m_full_ref, u_ref, vh_ref,   # inputs
                                 w_ref, mask_ref, pen_ref,                  # outputs
                                 acc_ref,                                   # scratch
                                 *, temperature, target_rank):
    k = pl.program_id(2)
    nk = pl.num_programs(2)
    temp = jnp.float32(temperature)

    # One-time work per (i, j): zero the accumulator, write the lane-dense mask
    # row and the SMEM scalar penalty.  Gating on k == 0 (not i==j==k==0) keeps
    # outputs correct even when the parallel i/j axes are sharded across cores
    # (redundant identical writes are harmless and cheap).
    @pl.when(k == 0)
    def _():
        acc_ref[...] = jnp.zeros_like(acc_ref)
        mask_full = jax.nn.sigmoid(m_full_ref[...] * temp)                 # (1, d)
        mask_ref[...] = mask_full
        pen_ref[0, 0] = (jnp.sum(mask_full) - jnp.float32(target_rank)) ** 2

    # W = (U * s_masked[None, :]) @ Vh : column-scale the U k-tile by the
    # k-tile of masked singular values; bf16 MXU operands, f32 accumulate.
    s_masked = s_ref[...] * jax.nn.sigmoid(m_ref[...] * temp)              # (1, tk) f32
    u_scaled = (u_ref[...].astype(jnp.float32) * s_masked).astype(jnp.bfloat16)
    acc_ref[...] += jnp.dot(u_scaled, vh_ref[...],
                            preferred_element_type=jnp.float32)

    @pl.when(k == nk - 1)
    def _():
        w_ref[...] = acc_ref[...].astype(w_ref.dtype)


def _pick_tile(d, preferred):
    """Largest power-of-two tile >= 128 that divides d, else the full dim."""
    t = min(preferred, d)
    while t >= 128:
        if d % t == 0:
            return t
        t //= 2
    return d


def rank_constrained_svd_forward(U, S_orig, Vh, M, *, temperature, target_rank,
                                 tm=256, tn=256, tk=512):
    """Pallas implementation of RankConstrainedSVD.forward().

    Returns (W_reconstructed (d, d) f32, mask (d,) f32, rank_penalty scalar f32).
    """
    d = U.shape[0]
    tm = _pick_tile(d, tm)
    tn = _pick_tile(d, tn)
    tk = _pick_tile(d, tk)
    grid = (d // tm, d // tn, d // tk)

    # bf16 operands for the MXU streams; S / M stay f32 so the mask / penalty
    # math keeps full precision.
    u_bf16 = U.astype(jnp.bfloat16)
    vh_bf16 = Vh.astype(jnp.bfloat16)
    s_row = S_orig.astype(jnp.float32).reshape(1, d)
    m_row = M.astype(jnp.float32).reshape(1, d)

    kernel = functools.partial(_rank_constrained_svd_kernel,
                               temperature=float(temperature),
                               target_rank=float(target_rank))

    out_shape = (
        jax.ShapeDtypeStruct((d, d), jnp.float32),   # W_reconstructed
        jax.ShapeDtypeStruct((1, d), jnp.float32),   # mask (lane-dense row)
        jax.ShapeDtypeStruct((1, 1), jnp.float32),   # rank penalty (SMEM scalar)
    )

    w_rec, mask_row, pen = pl.pallas_call(
        kernel,
        out_shape=out_shape,
        grid_spec=pltpu.PrefetchScalarGridSpec(
            num_scalar_prefetch=0,
            grid=grid,
            in_specs=[
                pl.BlockSpec((1, tk), lambda i, j, k: (0, k)),      # S_orig k-tile
                pl.BlockSpec((1, tk), lambda i, j, k: (0, k)),      # M k-tile
                pl.BlockSpec((1, d), lambda i, j, k: (0, 0)),       # M full row
                pl.BlockSpec((tm, tk), lambda i, j, k: (i, k)),     # U
                pl.BlockSpec((tk, tn), lambda i, j, k: (k, j)),     # Vh
            ],
            out_specs=(
                pl.BlockSpec((tm, tn), lambda i, j, k: (i, j)),     # W
                pl.BlockSpec((1, d), lambda i, j, k: (0, 0)),       # mask
                pl.BlockSpec(memory_space=pltpu.MemorySpace.SMEM),  # penalty
            ),
            scratch_shapes=[
                pltpu.VMEM((tm, tn), jnp.float32),   # f32 matmul accumulator
            ],
        ),
        compiler_params=pltpu.CompilerParams(
            dimension_semantics=("parallel", "parallel", "arbitrary"),
            vmem_limit_bytes=32 * 1024 * 1024,
        ),
    )(s_row, m_row, m_row, u_bf16, vh_bf16)

    return w_rec, mask_row.reshape(d), pen.reshape(())


if __name__ == "__main__":
    # ---- deterministic "module __init__" parameter setup (plain JAX glue) ----
    d = 256                       # weight_matrix is (d, d)  (small demo size)
    target_ratio = 0.3
    temperature = 10.0
    alpha = 1.0                   # unused in forward(); scales penalty in loss
    target_rank = int(target_ratio * d)

    key = jax.random.PRNGKey(0)
    k_w, k_m = jax.random.split(key)
    weight_matrix = jax.random.normal(k_w, (d, d), dtype=jnp.float32)
    M = jax.random.normal(k_m, (d,), dtype=jnp.float32)   # nn.Parameter(randn_like(S))

    # torch.linalg.svd(W, full_matrices=False) -> setup-time factorization
    U, S_orig, Vh = jnp.linalg.svd(weight_matrix, full_matrices=False)
    U = U.astype(jnp.float32)
    S_orig = S_orig.astype(jnp.float32)
    Vh = Vh.astype(jnp.float32)

    # ---- run the Pallas kernel (tm=tn=tk=128 -> a real 2x2x2 grid here) ----
    W_rec, mask, rank_penalty = rank_constrained_svd_forward(
        U, S_orig, Vh, M, temperature=temperature, target_rank=target_rank,
        tm=128, tn=128, tk=128)
    jax.block_until_ready((W_rec, mask, rank_penalty))

    # ---- reference check (same bf16-operand / f32-accumulate math) ----
    mask_ref = jax.nn.sigmoid(M * temperature)
    s_masked = S_orig * mask_ref
    u_bf = U.astype(jnp.bfloat16).astype(jnp.float32)
    u_scaled_ref = (u_bf * s_masked[None, :]).astype(jnp.bfloat16)
    W_ref = jnp.dot(u_scaled_ref, Vh.astype(jnp.bfloat16),
                    preferred_element_type=jnp.float32)
    pen_ref = (mask_ref.sum() - target_rank) ** 2

    assert W_rec.shape == (d, d) and mask.shape == (d,) and rank_penalty.shape == ()
    assert jnp.allclose(W_rec, W_ref, atol=2e-3, rtol=2e-3), \
        float(jnp.max(jnp.abs(W_rec - W_ref)))
    assert jnp.allclose(mask, mask_ref, atol=1e-5, rtol=1e-5)
    assert jnp.allclose(rank_penalty, pen_ref, atol=0.5, rtol=1e-3)

    print("KERNEL_OK")
</pallas_src>

<mosaic_0001>
module attributes {stable_mosaic.version = 11 : i64} {
  func.func @_rank_constrained_svd_kernel(%arg0: i32, %arg1: i32, %arg2: i32, %arg3: memref<1x128xf32, #tpu.memory_space<vmem>>, %arg4: memref<1x128xf32, #tpu.memory_space<vmem>>, %arg5: memref<1x256xf32, #tpu.memory_space<vmem>>, %arg6: memref<128x128xbf16, #tpu.memory_space<vmem>>, %arg7: memref<128x128xbf16, #tpu.memory_space<vmem>>, %arg8: memref<128x128xf32, #tpu.memory_space<vmem>>, %arg9: memref<1x256xf32, #tpu.memory_space<vmem>>, %arg10: memref<1x1xf32, #tpu.memory_space<smem>>, %arg11: memref<128x128xf32, #tpu.memory_space<vmem>>) attributes {dimension_semantics = [#tpu.dimension_semantics<parallel>, #tpu.dimension_semantics<parallel>, #tpu.dimension_semantics<arbitrary>], iteration_bounds = array<i64: 2, 2, 2>, scalar_prefetch = 0 : i64, scratch_operands = 1 : i64, tpu.core_type = #tpu.core_type<tc>, window_params = [{transform_indices = @transform_0, window_bounds = array<i64: 1, 128>}, {transform_indices = @transform_1, window_bounds = array<i64: 1, 128>}, {pipeline_mode = #tpu.pipeline_mode<synchronous>, transform_indices = @transform_2, window_bounds = array<i64: 1, 256>}, {transform_indices = @transform_3, window_bounds = array<i64: 128, 128>}, {transform_indices = @transform_4, window_bounds = array<i64: 128, 128>}, {transform_indices = @transform_5, window_bounds = array<i64: 128, 128>}, {pipeline_mode = #tpu.pipeline_mode<synchronous>, transform_indices = @transform_6, window_bounds = array<i64: 1, 256>}, {transform_indices = @transform_7, window_bounds = array<i64: 1, 1>}]} {
    %c0_i32 = arith.constant 0 : i32
    %0 = arith.cmpi eq, %arg2, %c0_i32 : i32
    %1 = arith.extui %0 : i1 to i32
    %cst = arith.constant 1.000000e+01 : f32
    %c0_i32_0 = arith.constant 0 : i32
    %2 = arith.cmpi ne, %1, %c0_i32_0 : i32
    scf.if %2 {
      %cst_16 = arith.constant 0.000000e+00 : f32
      %26 = vector.broadcast %cst_16 : f32 to vector<128x128xf32>
      %c0_17 = arith.constant 0 : index
      %c0_18 = arith.constant 0 : index
      %27 = vector.load %arg11[%c0_17, %c0_18] : memref<128x128xf32, #tpu.memory_space<vmem>>, vector<128x128xf32>
      tpu.vector_store %arg11[%c0_17, %c0_18], %26 {strides = array<i32>} : memref<128x128xf32, #tpu.memory_space<vmem>>, vector<128x128xf32>,
      %c0_19 = arith.constant 0 : index
      %c0_20 = arith.constant 0 : index
      %28 = vector.load %arg5[%c0_19, %c0_20] : memref<1x256xf32, #tpu.memory_space<vmem>>, vector<1x256xf32>
      %29 = vector.broadcast %cst : f32 to vector<1x256xf32>
      %30 = arith.mulf %28, %29 : vector<1x256xf32>
      %31 = arith.negf %30 : vector<1x256xf32>
      %32 = math.exp %31 : vector<1x256xf32>
      %cst_21 = arith.constant 1.000000e+00 : f32
      %33 = vector.broadcast %cst_21 : f32 to vector<1x256xf32>
      %34 = arith.addf %33, %32 : vector<1x256xf32>
      %35 = arith.divf %33, %34 : vector<1x256xf32>
      %c0_22 = arith.constant 0 : index
      %c0_23 = arith.constant 0 : index
      %36 = vector.load %arg9[%c0_22, %c0_23] : memref<1x256xf32, #tpu.memory_space<vmem>>, vector<1x256xf32>
      tpu.vector_store %arg9[%c0_22, %c0_23], %35 {strides = array<i32>} : memref<1x256xf32, #tpu.memory_space<vmem>>, vector<1x256xf32>,
      %37 = vector.shape_cast %35 : vector<1x256xf32> to vector<1x1x256xf32>
      %cst_24 = arith.constant dense<0.000000e+00> : vector<1xf32>
      %38 = vector.multi_reduction <add>, %37, %cst_24 [1, 2] : vector<1x1x256xf32> to vector<1xf32>
      %39 = vector.shape_cast %38 : vector<1xf32> to vector<1x1x1xf32>
      %40 = vector.extract %39[0, 0, 0] : f32 from vector<1x1x1xf32>
      %cst_25 = arith.constant 7.600000e+01 : f32
      %41 = arith.subf %40, %cst_25 : f32
      %42 = arith.mulf %41, %41 : f32
      %c0_26 = arith.constant 0 : index
      %c0_27 = arith.constant 0 : index
      %43 = memref.load %arg10[%c0_26, %c0_27] : memref<1x1xf32, #tpu.memory_space<smem>>
      memref.store %42, %arg10[%c0_26, %c0_27] : memref<1x1xf32, #tpu.memory_space<smem>>
    } else {
    }
    %c0 = arith.constant 0 : index
    %c0_1 = arith.constant 0 : index
    %3 = vector.load %arg3[%c0, %c0_1] : memref<1x128xf32, #tpu.memory_space<vmem>>, vector<1x128xf32>
    %c0_2 = arith.constant 0 : index
    %c0_3 = arith.constant 0 : index
    %4 = vector.load %arg4[%c0_2, %c0_3] : memref<1x128xf32, #tpu.memory_space<vmem>>, vector<1x128xf32>
    %cst_4 = arith.constant 1.000000e+01 : f32
    %5 = vector.broadcast %cst_4 : f32 to vector<1x128xf32>
    %6 = arith.mulf %4, %5 : vector<1x128xf32>
    %7 = arith.negf %6 : vector<1x128xf32>
    %8 = math.exp %7 : vector<1x128xf32>
    %cst_5 = arith.constant 1.000000e+00 : f32
    %9 = vector.broadcast %cst_5 : f32 to vector<1x128xf32>
    %10 = arith.addf %9, %8 : vector<1x128xf32>
    %11 = arith.divf %9, %10 : vector<1x128xf32>
    %12 = arith.mulf %3, %11 : vector<1x128xf32>
    %c0_6 = arith.constant 0 : index
    %c0_7 = arith.constant 0 : index
    %13 = vector.load %arg6[%c0_6, %c0_7] : memref<128x128xbf16, #tpu.memory_space<vmem>>, vector<128x128xbf16>
    %14 = arith.extf %13 : vector<128x128xbf16> to vector<128x128xf32>
    %15 = vector.broadcast %12 : vector<1x128xf32> to vector<128x128xf32>
    %16 = arith.mulf %14, %15 : vector<128x128xf32>
    %17 = arith.truncf %16 : vector<128x128xf32> to vector<128x128xbf16>
    %c0_8 = arith.constant 0 : index
    %c0_9 = arith.constant 0 : index
    %18 = vector.load %arg11[%c0_8, %c0_9] : memref<128x128xf32, #tpu.memory_space<vmem>>, vector<128x128xf32>
    %c0_10 = arith.constant 0 : index
    %c0_11 = arith.constant 0 : index
    %19 = vector.load %arg7[%c0_10, %c0_11] : memref<128x128xbf16, #tpu.memory_space<vmem>>, vector<128x128xbf16>
    %cst_12 = arith.constant dense<0.000000e+00> : vector<128x128xf32>
    %20 = tpu.matmul %17, %19, %cst_12 {dimension_numbers = #tpu.dot_dimension_numbers<[1], [0], [0], [1], [0, 0, 1, 1], [], []>} : vector<128x128xbf16>, vector<128x128xbf16>, vector<128x128xf32> -> vector<128x128xf32>
    %21 = arith.addf %18, %20 : vector<128x128xf32>
    %c0_13 = arith.constant 0 : index
    %c0_14 = arith.constant 0 : index
    %22 = vector.load %arg11[%c0_13, %c0_14] : memref<128x128xf32, #tpu.memory_space<vmem>>, vector<128x128xf32>
    tpu.vector_store %arg11[%c0_13, %c0_14], %21 {strides = array<i32>} : memref<128x128xf32, #tpu.memory_space<vmem>>, vector<128x128xf32>,
    %c1_i32 = arith.constant 1 : i32
    %23 = arith.cmpi eq, %arg2, %c1_i32 : i32
    %24 = arith.extui %23 : i1 to i32
    %c0_i32_15 = arith.constant 0 : i32
    %25 = arith.cmpi ne, %24, %c0_i32_15 : i32
    scf.if %25 {
      %c0_16 = arith.constant 0 : index
      %c0_17 = arith.constant 0 : index
      %26 = vector.load %arg11[%c0_16, %c0_17] : memref<128x128xf32, #tpu.memory_space<vmem>>, vector<128x128xf32>
      %c0_18 = arith.constant 0 : index
      %c0_19 = arith.constant 0 : index
      %27 = vector.load %arg8[%c0_18, %c0_19] : memref<128x128xf32, #tpu.memory_space<vmem>>, vector<128x128xf32>
      tpu.vector_store %arg8[%c0_18, %c0_19], %26 {strides = array<i32>} : memref<128x128xf32, #tpu.memory_space<vmem>>, vector<128x128xf32>,
    } else {
    }
    return
  }
  func.func @transform_0(%arg0: i32, %arg1: i32, %arg2: i32) -> (i32, i32) {
    %c0_i32 = arith.constant 0 : i32
    %c0_i32_0 = arith.constant 0 : i32
    return %c0_i32, %arg2 : i32, i32
  }
  func.func @transform_1(%arg0: i32, %arg1: i32, %arg2: i32) -> (i32, i32) {
    %c0_i32 = arith.constant 0 : i32
    %c0_i32_0 = arith.constant 0 : i32
    return %c0_i32, %arg2 : i32, i32
  }
  func.func @transform_2(%arg0: i32, %arg1: i32, %arg2: i32) -> (i32, i32) {
    %c0_i32 = arith.constant 0 : i32
    %c0_i32_0 = arith.constant 0 : i32
    %c0_i32_1 = arith.constant 0 : i32
    return %c0_i32, %c0_i32_0 : i32, i32
  }
  func.func @transform_3(%arg0: i32, %arg1: i32, %arg2: i32) -> (i32, i32) {
    %c0_i32 = arith.constant 0 : i32
    return %arg0, %arg2 : i32, i32
  }
  func.func @transform_4(%arg0: i32, %arg1: i32, %arg2: i32) -> (i32, i32) {
    %c0_i32 = arith.constant 0 : i32
    return %arg2, %arg1 : i32, i32
  }
  func.func @transform_5(%arg0: i32, %arg1: i32, %arg2: i32) -> (i32, i32) {
    %c0_i32 = arith.constant 0 : i32
    return %arg0, %arg1 : i32, i32
  }
  func.func @transform_6(%arg0: i32, %arg1: i32, %arg2: i32) -> (i32, i32) {
    %c0_i32 = arith.constant 0 : i32
    %c0_i32_0 = arith.constant 0 : i32
    %c0_i32_1 = arith.constant 0 : i32
    return %c0_i32, %c0_i32_0 : i32, i32
  }
  func.func @transform_7(%arg0: i32, %arg1: i32, %arg2: i32) -> (i32, i32) {
    %c0_i32 = arith.constant 0 : i32
    %c0_i32_0 = arith.constant 0 : i32
    %c0_i32_1 = arith.constant 0 : i32
    return %c0_i32, %c0_i32_0 : i32, i32
  }
}

</mosaic_0001>

<bundles_post_ra>
// kernel: tpu_custom_call.1
= control target key start
LH: loop header
LB: loop body
LE: loop exit
PB: predicated region body
PF: predicated region fallthrough
CT: control target
= control target key end

     0   :  { %s2320_s0 = inlined_call_operand.hbm [shape: f32[1,256], index: 0, kind: input, shape index: {}]   ;;  %s2321_s1 = inlined_call_operand.vmem [shape: f32[1,256], index: 1, kind: input, shape index: {}]   ;;  %s2322_s2 = inlined_call_operand.vmem [shape: f32[1,256], index: 2, kind: input, shape index: {}]   ;;  %s2323_s3 = inlined_call_operand.hbm [shape: bf16[256,256], index: 3, kind: input, shape index: {}]   ;;  %s2324_s4 = inlined_call_operand.hbm [shape: bf16[256,256], index: 4, kind: input, shape index: {}]   ;;  %s2325_s5 = inlined_call_operand.hbm [shape: f32[256,256], index: 5, kind: output, shape index: {0}]   ;;  %s2326_s6 = inlined_call_operand.hbm [shape: f32[1,256], index: 6, kind: output, shape index: {1}]   ;;  %s2327_s7 = inlined_call_operand.hbm [shape: f32[1,1], index: 7, kind: output, shape index: {2}]  }
   0x1   :  { %2357 = sst [smem:[#allocation36_spill]] %s2320_s0 }
   0x2   :  { %2358 = sst [smem:[#allocation37_spill]] %s2321_s1 }
   0x3   :  { %2359 = sst [smem:[#allocation38_spill]] %s2322_s2 }
   0x4   :  { %2360 = sst [smem:[#allocation39_spill]] %s2323_s3 }
   0x5   :  { %2361 = sst [smem:[#allocation40_spill]] %s2325_s5 }
   0x6   :  { %2362 = sst [smem:[#allocation41_spill]] %s2326_s6 }
   0x7   :  { %2363 = sst [smem:[#allocation42_spill]] %s2327_s7 }
   0x8   :  { %13 = vsyncpa [#allocation4], 0 }
   0x9   :  { %15 = vsyncpa [#allocation4 + $0x1], 0 }
   0xa   :  { %16 = vsyncpa [#allocation8], 0 }
   0xb   :  { %18 = vsyncpa [#allocation8 + $0x1], 0 }
   0xc   :  { %19 = vsyncpa [#allocation5], 0 }
   0xd   :  { %21 = vsyncpa [#allocation5 + $0x1], 0 }
   0xe   :  { %22 = vsyncpa [#allocation12], 0 }
   0xf   :  { %23 = vsyncpa [#allocation6], 0  ;;  %s1742_s24 = smov 0   ;;  %s1744_s25 = smov 0  }
  0x10   :  { %s1746_s26 = smov 0   ;;  %s1748_s27 = smov 0  }
  0x11   :  { %s1750_s28 = smov 0   ;;  %s1752_s29 = smov 0  }
  0x12   :  { %s1754_s30 = smov 0   ;;  %s1756_s8 = smov 0  }
  0x13   :  { %s1758_s9 = smov 0   ;;  %s1760_s10 = smov 0  }
  0x14   :  { %s1762_s11 = smov 0   ;;  %s1764_s12 = smov 0  }
  0x15   :  { %s1766_s13 = smov 0   ;;  %s1768_s14 = smov 0  }
  0x16   :  { %s1770_s15 = smov 0   ;;  %s1772_s16 = smov 0  }
  0x17   :  { %s1774_s17 = smov 0   ;;  %s1776_s18 = smov 0  }
  0x18   :  { %s1778_s19 = smov 0  }
  0x19 LB: > { %2364 = sst [smem:[#allocation20_spill]] %s1615_s24  ;;  %p2336_p0 = scmp.eq.s32.totalorder %s1687_s19, 0  ;;  %s1687_s19 = sphi %s1778_s19, %s29_s19   ;;  %s1683_s18 = sphi %s1776_s18, %s2460_s18   ;;  %s1679_s17 = sphi %s1774_s17, %s2446_s17   ;;  %s1675_s16 = sphi %s1772_s16, %s2459_s16   ;;  %s1671_s15 = sphi %s1770_s15, %s2458_s15   ;;  %s1667_s14 = sphi %s1768_s14, %s2457_s14   ;;  %s1663_s13 = sphi %s1766_s13, %s2442_s13   ;;  %s1659_s12 = sphi %s1764_s12, %s2441_s12   ;;  %s1655_s11 = sphi %s1762_s11, %s2456_s11   ;;  %s1651_s10 = sphi %s1760_s10, %s2455_s10   ;;  %s1647_s9 = sphi %s1758_s9, %s2454_s9   ;;  %s1643_s8 = sphi %s1756_s8, %s2453_s8   ;;  %s1639_s30 = sphi %s1754_s30, %s2439_s30   ;;  %s1635_s29 = sphi %s1752_s29, %s2452_s29   ;;  %s1631_s28 = sphi %s1750_s28, %s2451_s28   ;;  %s1627_s27 = sphi %s1748_s27, %s2450_s27   ;;  %s1623_s26 = sphi %s1746_s26, %s2449_s26   ;;  %s1619_s25 = sphi %s1744_s25, %s2447_s25   ;;  %s1615_s24 = sphi %s1742_s24, %s2445_s24  }
  0x1a   : > { %2365 = sst [smem:[#allocation21_spill]] %s1643_s8  ;;  %p137_p1 = scmp.ne.s32.totalorder %s1647_s9, %s1643_s8 }
  0x1b   : > { %2366 = sst [smem:[#allocation22_spill]] %s1659_s12  ;;  %p2332_p4 = scmp.lt.s32.totalorder %s1687_s19, 8 }
  0x1c   : > { %2367 = sst [smem:[#allocation23_spill]] %s1663_s13  ;;  %p139_p3 = por %p137_p1, %p2336_p0 }
  0x1d   : > { %2368 = sst [smem:[#allocation24_spill]] %s1667_s14  ;;  %s291_s22 = sand.u32 1, %s1687_s19  }
  0x1e   : > { %2369 = sst [smem:[#allocation25_spill]] %s1671_s15  ;;  %s293_s23 = sand.u32 1, %s1647_s9  }
  0x1f   : > { %2370 = sst [smem:[#allocation26_spill]] %s1675_s16  ;;  %s1001_s7 = sshll.u32 %s293_s23, 6 }
  0x20   : > { %2371 = sst [smem:[#allocation27_spill]] %s1679_s17  ;;  %s1036_s6 = sshll.u32 %s1683_s18, 5 }
  0x21   : > { %s301_s5 = sadd.s32 %s1675_s16, %s1036_s6  ;;  %s295_s14 = scalar_lea.vmem [#allocation7], %s1001_s7 }
  0x22   : > { %s304_s15 = sshll.u32 %s295_s14, 4  ;;  %s1004_s2 = sshll.u32 %s301_s5, 6  ;;  %s1851_s15 = int_to_ptr.vmem [resolvable:$true] %s304_s15 }
  0x23   : > { %s2372_s3 = sld [smem:[#allocation39_spill]]  ;;  %p1860_p5 = pnand %p2332_p4, %p139_p3 }
  0x24   : > { %s1864_s6 = scalar_lea.sflag [#allocation8], %s291_s22 }
  0x25   : > { %p1359_p7 = pneg %p1860_p5 }
  0x29   : > { %s1856_s13 = scalar_lea.hbm %s2372_s3, %s1004_s2  ;;  %s1362_s7 = scalar_lea.hbm %s2372_s3, 4096 }
  0x2a   : > { %s1357_s5 = scalar_lea.hbm %s1856_s13, 1024  ;;  %p1363_p10 = scmp.lt.u32.totalorder %s1856_s13, %s2372_s3 }
  0x2b   : > { %p1358_p6 = scmp.ne.s32.totalorder %s1856_s13, %s1357_s5  ;;  %p1364_p11 = scmp.lt.u32.totalorder %s1362_s7, %s1357_s5 }
  0x2c   : > { %p1366_p13 = scmp.lt.u32.totalorder %s1357_s5, %s1856_s13 }
  0x2d   : > { %p1360_p8 = pnand %p1359_p7, %p1358_p6  ;;  %p1365_p12 = por %p1364_p11, %p1363_p10 }
  0x2f   : > { %p1361_p9 = pneg %p1360_p8  ;;  %p1367_p1 = por %p1366_p13, %p1365_p12 }
  0x31   : > { %p1368_p3 = pnand %p1367_p1, %p1361_p9 }
  0x33   : > { %1371 = shalt.err (!%p1368_p3)
}
  0x34   : > { %s1372_s22 = scalar_lea.vmem %s1851_s15, 1024  ;;  %s1689_s23 = smov [#allocation7]  }
  0x35   : > { %p1373_p6 = scmp.ne.s32.totalorder %s1851_s15, %s1372_s22  ;;  %s1377_s1 = sshll.u32 %s1689_s23, 4  ;;  %s1378_s1 = int_to_ptr.vmem [resolvable:$false] %s1377_s1 }
  0x36   : > { %s1379_s2 = scalar_lea.vmem %s1378_s1, 2048  ;;  %p1380_p2 = scmp.lt.s32.totalorder %s1851_s15, %s1378_s1 }
  0x37   : > { %p1375_p8 = pnand %p1373_p6, %p1359_p7  ;;  %p1381_p10 = scmp.lt.s32.totalorder %s1379_s2, %s1372_s22 }
  0x39   : > { %p1376_p4 = pneg %p1375_p8  ;;  %p1382_p11 = por %p1381_p10, %p1380_p2 }
  0x3b   : > { %p1383_p12 = pnand %p1382_p11, %p1376_p4 }
  0x3d   : > { %1386 = shalt.err (!%p1383_p12)
}
  0x3e   : > { %s2333_s5 = smov 128   ;;  %s2334_s7 = smov 64  }
  0x3f   : > { %s2335_s14 = smov 4   ;;  %p1009_p2 = scmp.ge.s32.totalorder %s1687_s19, 1 }
  0x40   : > { %1166 = dma.hbm_to_vmem [thread:$0]  (!%p1860_p5), %s1856_s13, 1024, %s1851_s15, %s1864_s6, %s2333_s5, %s2334_s7, %s2335_s14  }
  0x41   : > { %p335_p4 = scmp.lt.s32.totalorder %s1687_s19, 9  ;;  %s1902_s22 = sadd.s32 4294967295, %s1687_s19  }
  0x42   : > { %s997_s23 = sadd.s32 4294967294, %s1687_s19   ;;  %s41_s21 = sadd.s32 1, %s1675_s16 }
  0x43   : > { %p1897_p7 = pnand %p1009_p2, %p335_p4  ;;  %p1906_p9 = scmp.ge.s32.totalorder %s41_s21, 2 }
  0x44   : > { %s55_s13 = sadd.s32 1, %s1659_s12  ;;  %p62_p5 = scmp.ne.s32.totalorder %s1659_s12, %s1655_s11 }
  0x45   : > { %s2374_s20 = scalar_select %p1897_p7, 1, 0 }
  0x46   : > { %p68_p13 = scmp.ne.s32.totalorder %s1655_s11, %s1651_s10  ;;  %s2462_s21 = smov (%p1906_p9, %s41_s21), 0 }
  0x47   : > { %2376 = sst [smem:[#allocation28_spill]] %s2462_s21  ;;  %p1921_p1 = por %p2336_p0, %p62_p5 }
  0x48   : > { %p69_p3 = scmp.eq.s32.totalorder %s1902_s22, 0  ;;  %s1928_s2 = ssub.s32 %s1675_s16, %s2462_s21 }
  0x49   : > { %p171_p6 = scmp.ne.s32.totalorder %s1631_s28, %s1627_s27  ;;  %p53_p8 = scmp.eq.s32.totalorder %s1928_s2, 0 }
  0x4a   : > { %p1933_p10 = por %p69_p3, %p68_p13  ;;  %p2379_p11 = scmp.ne.s32.totalorder %s1643_s8, %s1639_s30 }
  0x4b   : > { %p1944_p2 = por %p171_p6, %p69_p3  ;;  %p196_p4 = scmp.ne.s32.totalorder %s1623_s26, %s1619_s25 }
  0x4c   : > { %s2378_s10 = scalar_select %p1933_p10, 1, 0 }
  0x4d   : > { %p1940_p12 = por %p2379_p11, %p69_p3  ;;  %p2346_p5 = scmp.eq.s32.totalorder %s1902_s22, 7 }
  0x4e   : > { %s2382_s7 = scalar_select %p1944_p2, 1, 0 }
  0x4f   : > { %s2380_s5 = scalar_select %p1940_p12, 1, 0 }
  0x50   : > { %2383 = sst [smem:[#allocation30_spill]] %s2382_s7  ;;  %p202_p13 = scmp.ne.s32.totalorder %s1619_s25, %s1615_s24 }
  0x51   : > { %2381 = sst [smem:[#allocation29_spill]] %s2380_s5  ;;  %p203_p0 = scmp.eq.s32.totalorder %s997_s23, 7 }
  0x52   : > { %s1949_s14 = scalar_select %p53_p8, %s1659_s12, %s55_s13  }
  0x53   : > { %s268_s27 = sand.u32 1, %s1659_s12   ;;  %p1960_p10 = por %p2346_p5, %p196_p4 }
  0x54   : > { %2384 = sst [smem:[#allocation31_spill]] %s1949_s14  ;;  %p1964_p11 = por %p203_p0, %p202_p13 }
  0x55   : > { %s2385_s30 = scalar_select %p1960_p10, 1, 0 }
  0x56   : > { %s2387_s21 = scalar_select %p1964_p11, 1, 0 }
  0x57   : > { %2386 = sst [smem:[#allocation32_spill]] %s2385_s30  ;;  %s1000_s5 = sshll.u32 %s1675_s16, 4 }
  0x58   : > { %2388 = sst [smem:[#allocation33_spill]] %s2387_s21  ;;  %s271_s8 = scalar_lea.vmem [#allocation3], %s268_s27 }
  0x59   : > { %s278_s7 = sshll.u32 %s271_s8, 4  ;;  %s2389_s0 = sld [smem:[#allocation36_spill]]  ;;  %s1974_s7 = int_to_ptr.vmem [resolvable:$true] %s278_s7 }
  0x5a   : > { %p2390_p3 = scmp.lt.s32.totalorder %s1687_s19, 8  ;;  %s269_s8 = scalar_lea.sflag [#allocation4], %s268_s27 }
  0x5c   : > { %p1980_p0 = pnand %p2390_p3, %p1921_p1 }
  0x5e   : > { %p1389_p8 = pneg %p1980_p0 }
  0x5f   : > { %s1972_s3 = scalar_lea.hbm %s2389_s0, %s1000_s5  ;;  %s1392_s15 = scalar_lea.hbm %s2389_s0, 32 }
  0x60   : > { %s1387_s12 = scalar_lea.hbm %s1972_s3, 16  ;;  %p1393_p1 = scmp.lt.u32.totalorder %s1972_s3, %s2389_s0 }
  0x61   : > { %p1388_p6 = scmp.ne.s32.totalorder %s1972_s3, %s1387_s12  ;;  %p1394_p3 = scmp.lt.u32.totalorder %s1392_s15, %s1387_s12 }
  0x62   : > { %p1396_p11 = scmp.lt.u32.totalorder %s1387_s12, %s1972_s3 }
  0x63   : > { %p1390_p4 = pnand %p1389_p8, %p1388_p6  ;;  %p1395_p5 = por %p1394_p3, %p1393_p1 }
  0x65   : > { %p1391_p13 = pneg %p1390_p4  ;;  %p1397_p10 = por %p1396_p11, %p1395_p5 }
  0x67   : > { %p1398_p2 = pnand %p1397_p10, %p1391_p13 }
  0x69   : > { %1401 = shalt.err (!%p1398_p2)
}
  0x6a   : > { %s1402_s27 = scalar_lea.vmem %s1974_s7, 16  ;;  %s1693_s5 = smov [#allocation3]  }
  0x6b   : > { %p1403_p6 = scmp.ne.s32.totalorder %s1974_s7, %s1402_s27  ;;  %s1407_s14 = sshll.u32 %s1693_s5, 4  ;;  %s1408_s14 = int_to_ptr.vmem [resolvable:$false] %s1407_s14 }
  0x6c   : > { %s1409_s21 = scalar_lea.vmem %s1408_s14, 32  ;;  %p1410_p7 = scmp.lt.s32.totalorder %s1974_s7, %s1408_s14 }
  0x6d   : > { %p1405_p4 = pnand %p1403_p6, %p1389_p8  ;;  %p1411_p1 = scmp.lt.s32.totalorder %s1409_s21, %s1402_s27 }
  0x6f   : > { %p1406_p12 = pneg %p1405_p4  ;;  %p1412_p3 = por %p1411_p1, %p1410_p7 }
  0x71   : > { %p1413_p5 = pnand %p1412_p3, %p1406_p12 }
  0x73   : > { %1416 = shalt.err (!%p1413_p5)
}
  0x74   : > { %1163 = dma.hbm_to_vmem [thread:$0]  (!%p1980_p0), %s1972_s3, 16, %s1974_s7, %s269_s8  }
  0x75   : > { %s44_s12 = sadd.s32 1, %s1679_s17  ;;  %s158_s15 = sadd.s32 1, %s1635_s29 }
  0x76   : > { %s2464_s12 = smov (!%p1906_p9, %s44_s12), %s1679_s17  ;;  %p165_p7 = scmp.ne.s32.totalorder %s1635_s29, %s1631_s28 }
  0x77   : > { %s316_s23 = sand.u32 1, %s1635_s29   ;;  %p46_p10 = scmp.ge.s32.totalorder %s2464_s12, 2 }
  0x78   : > { %s1005_s13 = sshll.u32 %s316_s23, 6  ;;  %p2392_p12 = scmp.eq.s32.totalorder %s1687_s19, 0 }
  0x79   : > { %s2466_s12 = smov (%p46_p10, %s2464_s12), 0  ;;  %s2395_s3 = sadd.s32 1, %s1683_s18 }
  0x7a   : > { %p2019_p2 = por %p165_p7, %p2392_p12  ;;  %2394 = sst [smem:[#allocation34_spill]] %s2466_s12 }
  0x7b   : > { %s2468_s3 = smov (!%p46_p10, %s2395_s3), %s1683_s18  ;;  %s154_s7 = ssub.s32 %s1679_s17, %s2466_s12 }
  0x7c   : > { %s1037_s1 = sshll.u32 %s1675_s16, 5  ;;  %p50_p9 = scmp.ge.s32.totalorder %s2468_s3, 2 }
  0x7d   : > { %s155_s8 = sor.u32 %s154_s7, %s1928_s2  ;;  %s324_s5 = sadd.s32 %s1679_s17, %s1037_s1 }
  0x7e   : > { %p156_p11 = scmp.eq.s32.totalorder %s155_s8, 0  ;;  %s2470_s3 = smov (%p50_p9, %s2468_s3), 0 }
  0x7f   : > { %2396 = sst [smem:[#allocation35_spill]] %s2470_s3  ;;  %s125_s21 = ssub.s32 %s1683_s18, %s2470_s3 }
  0x80   : > { %s2036_s14 = scalar_select %p156_p11, %s1635_s29, %s158_s15  }
  0x81   : > { %s1008_s23 = sshll.u32 %s324_s5, 6  ;;  %s127_s0 = sor.u32 %s125_s21, %s1928_s2 }
  0x82   : > { %s183_s12 = sor.u32 %s154_s7, %s125_s21  ;;  %p128_p0 = scmp.eq.s32.totalorder %s127_s0, 0 }
  0x83   : > { %p184_p8 = scmp.eq.s32.totalorder %s183_s12, 0  ;;  %s2044_s30 = scalar_lea.hbm %s2324_s4, %s1008_s23 }
  0x84   : > { %s318_s1 = scalar_lea.vmem [#allocation9], %s1005_s13  ;;  %s2397_s17 = sadd.s32 1, %s1647_s9 }
  0x85   : > { %s327_s8 = sshll.u32 %s318_s1, 4  ;;  %s2398_s3 = sadd.s32 1, %s1623_s26  ;;  %s2056_s8 = int_to_ptr.vmem [resolvable:$true] %s327_s8 }
  0x86   : > { %s2049_s15 = scalar_select %p128_p0, %s1647_s9, %s2397_s17  }
  0x87   : > { %s2054_s5 = scalar_select %p184_p8, %s1623_s26, %s2398_s3  }
  0x88   : > { %p2399_p13 = scmp.lt.s32.totalorder %s1687_s19, 8  ;;  %s1417_s24 = scalar_lea.hbm %s2044_s30, 1024 }
  0x89   : > { %p1418_p4 = scmp.ne.s32.totalorder %s2044_s30, %s1417_s24  ;;  %s1422_s2 = scalar_lea.hbm %s2324_s4, 4096 }
  0x8a   : > { %p2062_p6 = pnand %p2399_p13, %p2019_p2  ;;  %p1423_p7 = scmp.lt.u32.totalorder %s2044_s30, %s2324_s4 }
  0x8b   : > { %p1424_p10 = scmp.lt.u32.totalorder %s1422_s2, %s1417_s24  ;;  %p1426_p2 = scmp.lt.u32.totalorder %s1417_s24, %s2044_s30 }
  0x8c   : > { %p1419_p1 = pneg %p2062_p6 }
  0x8d   : > { %p1425_p12 = por %p1424_p10, %p1423_p7 }
  0x8e   : > { %p1420_p3 = pnand %p1419_p1, %p1418_p4 }
  0x8f   : > { %p1427_p9 = por %p1426_p2, %p1425_p12 }
  0x90   : > { %p1421_p5 = pneg %p1420_p3 }
  0x92   : > { %p1428_p11 = pnand %p1427_p9, %p1421_p5 }
  0x94   : > { %1431 = shalt.err (!%p1428_p11)
}
  0x95   : > { %s1432_s27 = scalar_lea.vmem %s2056_s8, 1024  ;;  %s1694_s3 = smov [#allocation9]  }
  0x96   : > { %p1433_p0 = scmp.ne.s32.totalorder %s2056_s8, %s1432_s27  ;;  %s1437_s7 = sshll.u32 %s1694_s3, 4  ;;  %s1438_s7 = int_to_ptr.vmem [resolvable:$false] %s1437_s7 }
  0x97   : > { %s1439_s21 = scalar_lea.vmem %s1438_s7, 2048  ;;  %p1440_p4 = scmp.lt.s32.totalorder %s2056_s8, %s1438_s7 }
  0x98   : > { %p1435_p8 = pnand %p1433_p0, %p1419_p1  ;;  %p1441_p3 = scmp.lt.s32.totalorder %s1439_s21, %s1432_s27 }
  0x9a   : > { %p1436_p13 = pneg %p1435_p8  ;;  %p1442_p7 = por %p1441_p3, %p1440_p4 }
  0x9c   : > { %p1443_p10 = pnand %p1442_p7, %p1436_p13 }
  0x9e   : > { %1446 = shalt.err (!%p1443_p10)
}
  0x9f   : > { %s2401_s23 = smov 4   ;;  %s2402_s1 = smov 64  }
  0xa0   : > { %s2403_s24 = smov 128   ;;  %p2404_p1 = scmp.ne.s32.totalorder %s2374_s20, 0 }
  0xa1   : > { %1169 = dma.hbm_to_vmem [thread:$0]  (!%p2062_p6), %s2044_s30, 1024, %s2056_s8, %s1864_s6, %s2403_s24, %s2402_s1, %s2401_s23  }
  0xa2   : > { %339 = sbr.rel (%p2404_p1) target bundleno = 804 (0x324), region = 40  ;;  %s341_s16 = sand.u32 (!%p2404_p1), 1, %s1655_s11  }
  0xa3   : > { %s342_s17 = scalar_lea.sflag (!%p2404_p1), [#allocation4], %s341_s16  ;;  %s2098_s2 = scalar_lea.vmem (!%p2404_p1), [#allocation3], %s341_s16 }
  0xa4   : > { %p2405_p5 = scmp.ne.s32.totalorder (!%p2404_p1), %s2378_s10, 0 }
  0xa9   : > { %1590 = dma.done.wait (%p2405_p5), %s342_s17, 16  }
  0xaa   : > { %1592 = vsyncadd (%p2405_p5), %s342_s17, 4294967280  ;;  %s2406_s0 = sld [smem:[#allocation21_spill]]  ;;  %s2407_s12 = sld [smem:[#allocation29_spill]] }
  0xab   : > { %s349_s13 = sand.u32 1, %s1902_s22  }
  0xac   : > { %s350_s30 = scalar_lea.sflag [#allocation8], %s349_s13 }
  0xb0   : > { %s351_s27 = sand.u32 1, %s2406_s0   ;;  %p2408_p6 = scmp.ne.s32.totalorder %s2407_s12, 0 }
  0xb1   : > { %s1010_s6 = sshll.u32 %s351_s27, 6 }
  0xb2   : > { %s2106_s20 = scalar_lea.vmem [#allocation7], %s1010_s6 }
  0xb3   : > { %1594 = dma.done.wait (%p2408_p6), %s350_s30, 1024  }
  0xb4   : > { %1596 = vsyncadd (%p2408_p6), %s350_s30, 4294966272  ;;  %s2409_s8 = sld [smem:[#allocation30_spill]]  ;;  %s360_s3 = sand.u32 1, %s1631_s28  }
  0xb5   : > { %s1011_s7 = sshll.u32 %s360_s3, 6 }
  0xb6   : > { %s2113_s10 = scalar_lea.vmem [#allocation9], %s1011_s7 }
  0xba   : > { %p2410_p12 = scmp.ne.s32.totalorder %s2409_s8, 0 }
  0xbc   : > { %1598 = dma.done.wait (%p2410_p12), %s350_s30, 1024  }
  0xbd   : > { %1600 = vsyncadd (%p2410_p12), %s350_s30, 4294966272  ;;  %s2411_s21 = sld [smem:[#allocation23_spill]]  ;;  %s398_s23 = sand.u32 1, %s1619_s25  }
  0xbe   : > { %s1012_s1 = sshll.u32 %s398_s23, 7  ;;  %s2412_s0 = sld [smem:[#allocation37_spill]] }
  0xbf   : > { %s2130_s13 = scalar_lea.vmem [#allocation10], %s1012_s1 }
  0xc3   : > { %p405_p2 = scmp.lt.s32.totalorder %s2411_s21, 1  ;;  %p1013_p9 = scmp.ne.s32.totalorder %s2411_s21, 0 }
  0xc4   : > { %s2413_s30 = sld [smem:[#allocation38_spill]] (!%p1013_p9)  ;;  %v1695_v1 = vmov (!%p1013_p9), 0.0   ;;  %v440_v6 = vlaneseq (!%p1013_p9)  ;;  %vm456_vm1 = vcmask (!%p1013_p9), 1040384  }
  0xc5   : > { %s2124_s24 = scalar_select %p405_p2, %s2411_s21, 1 }
  0xc6   : > { %415 = sbr.rel (%p1013_p9) target bundleno = 445 (0x1bd), region = 56  ;;  %416 = vst [vmem:[#allocation2] sm:$0xff] (!%p1013_p9), %v1695_v1  ;;  %417 = vst [vmem:[#allocation2 + $0x8] sm:$0xff] (!%p1013_p9), %v1695_v1  ;;  %v447_v7 = vshrl.u32 (!%p1013_p9), %v440_v6, 7  ;;  %vm442_vm0 = vcmp.lt.s32.totalorder (!%p1013_p9), %v440_v6, 256 }
  0xc7   : > { %s407_s12 = scalar_lea.vmem %s2412_s0, %s2124_s24  ;;  %418 = vst [vmem:[#allocation2 + $0x10] sm:$0xff] (!%p1013_p9), %v1695_v1  ;;  %419 = vst [vmem:[#allocation2 + $0x18] sm:$0xff] (!%p1013_p9), %v1695_v1 }
  0xc8   : > { %420 = vst [vmem:[#allocation2 + $0x20] sm:$0xff] (!%p1013_p9), %v1695_v1  ;;  %421 = vst [vmem:[#allocation2 + $0x28] sm:$0xff] (!%p1013_p9), %v1695_v1  ;;  %v448_v8 = vsub.s32 (!%p1013_p9), 0, %v447_v7  ;;  %v452_v9 = vsub.s32 (!%p1013_p9), 1, %v447_v7 }
  0xc9   : > { %422 = vst [vmem:[#allocation2 + $0x30] sm:$0xff] (!%p1013_p9), %v1695_v1  ;;  %423 = vst [vmem:[#allocation2 + $0x38] sm:$0xff] (!%p1013_p9), %v1695_v1 }
  0xca   : > { %v432_v0 = vld [vmem:[%s2413_s30] sm:$0x3] (!%p1013_p9)  ;;  %424 = vst [vmem:[#allocation2 + $0x40] sm:$0xff] (!%p1013_p9), %v1695_v1  ;;  %425 = vst [vmem:[#allocation2 + $0x48] sm:$0xff] (!%p1013_p9), %v1695_v1 }
  0xcb   : > { %426 = vst [vmem:[#allocation2 + $0x50] sm:$0xff] (!%p1013_p9), %v1695_v1  ;;  %427 = vst [vmem:[#allocation2 + $0x58] sm:$0xff] (!%p1013_p9), %v1695_v1  ;;  %v1014_v2 = vmul.f32 (!%p1013_p9), -10.0, %v432_v0 }
  0xcc   : > { %428 = vst [vmem:[#allocation2 + $0x60] sm:$0xff] (!%p1013_p9), %v1695_v1  ;;  %429 = vst [vmem:[#allocation2 + $0x68] sm:$0xff] (!%p1013_p9), %v1695_v1 }
  0xcd   : > { %430 = vst [vmem:[#allocation2 + $0x70] sm:$0xff] %v1695_v1  ;;  %431 = vst [vmem:[#allocation2 + $0x78] sm:$0xff] %v1695_v1  ;;  %v435_v3 = vmul.f32 1.442695, %v1014_v2 }
  0xcf   : > { %1341 = vpow2.f32 %v435_v3 }
  0xd9   : > { %v1342_v4 = vpop.eup %1341 }
  0xda   : > { %v437_v5 = vadd.f32 1.0, %v1342_v4 }
  0xdc   : > { %1343 = vrcp.f32 %v437_v5 }
  0xe6   : > { %v1344_v10 = vpop.eup %1343 }
  0xe7   : > { %444 = vst.msk [vmem:[#allocation11] sm:$0x3] %vm442_vm0, %v1344_v10  ;;  %v449_v11 = vrot.slane %v1344_v10, %v448_v8  ;;  %v453_v12 = vrot.slane %v1344_v10, %v452_v9 }
  0xe9   : > { %v457_v13 = vsel %vm456_vm1, %v449_v11, 0.0  ;;  %v458_v14 = vsel %vm456_vm1, %v453_v12, 0.0 }
  0xea   : > { %v459_v15 = vadd.f32 %v458_v14, %v457_v13 }
  0xec   : > { %460 = vadd.xlane.f32.xlu0 %v459_v15 }
 0x179   : > { %v461_v16 = vpop.xlane.xlu0 %460 }
 0x17a   : > { %v462_v17 = vrot.slane %v461_v16, 4 }
 0x17c   : > { %v463_v18 = vadd.f32 %v462_v17, %v461_v16 }
 0x17e   : > { %v464_v19 = vrot.slane %v463_v18, 2 }
 0x180   : > { %v465_v20 = vadd.f32 %v464_v19, %v463_v18 }
 0x182   : > { %v466_v21 = vrot.slane %v465_v20, 1 }
 0x184   : > { %v467_v22 = vadd.f32 %v466_v21, %v465_v20 }
 0x186   : > { %1142 = vpush %v467_v22 }
 0x1b7   : > { %s1143_s8 = spop %1142 }
 0x1b8   : > { %s1015_s3 = sadd.f32 -76.0, %s1143_s8 }
 0x1ba   : > { %s470_s7 = smul.f32 %s1015_s3, %s1015_s3 }
 0x1bc   : > { %472 = sst [smem:[#allocation13]] %s470_s7 }
 0x1bd PF: > { %v1345_v23 = vld [vmem:[%s2113_s10] sm:$0xff]   ;;  %v1346_v24 = vld [vmem:[%s2113_s10 + $0x8] sm:$0xff]   ;;  %v1347_v25 = vld [vmem:[%s2113_s10 + $0x10] sm:$0xff]   ;;  %v516_v36 = vlaneseq }
 0x1be   : > { %1094 = vmatprep.subr.bf16.mxu0 %v1345_v23  ;;  %1126 = vmatprep.subr.bf16.mxu1 %v1345_v23  ;;  %v1348_v26 = vld [vmem:[%s2113_s10 + $0x18] sm:$0xff]   ;;  %v1349_v30 = vld [vmem:[%s2113_s10 + $0x20] sm:$0xff]   ;;  %v1350_v31 = vld [vmem:[%s2113_s10 + $0x28] sm:$0xff]  }
 0x1bf   : > { %1095 = vmatpush3.bf16.msra.mxu0 %v1345_v23  ;;  %1134 = vmatpush3.bf16.msra.mxu1 %v1345_v23  ;;  %v474_v27 = vld [vmem:[%s407_s12] sm:$0x1]  ;;  %v1351_v32 = vld [vmem:[%s2113_s10 + $0x30] sm:$0xff]   ;;  %v517_v37 = vshrl.u32 %v516_v36, 7  ;;  %v1040_v38 = vld [vmem:[%s2106_s20] sm:$0xff]  }
 0x1c0   : > { %1096 = vmatprep.subr.bf16.mxu0 %v1346_v24  ;;  %1127 = vmatprep.subr.bf16.mxu1 %v1346_v24  ;;  %v1016_v28 = vmul.f32 -10.0, %v474_v27  ;;  %v1352_v34 = vld [vmem:[%s2113_s10 + $0x38] sm:$0xff]   ;;  %v1074_v40 = vld [vmem:[%s2106_s20 + $0x20] sm:$0xff]   ;;  %v1071_v41 = vld [vmem:[%s2106_s20 + $0x8] sm:$0xff]   ;;  %v1041_v46 = vunpack.c.l.bf16 %v1040_v38  ;;  %v1042_v47 = vunpack.c.h.bf16 %v1040_v38 }
 0x1c1   : > { %v473_v39 = vld [vmem:[%s2098_s2] sm:$0x1]  ;;  %v518_v42 = vsub.s32 0, %v517_v37  ;;  %v1075_v43 = vld [vmem:[%s2106_s20 + $0x28] sm:$0xff]   ;;  %v1072_v44 = vld [vmem:[%s2106_s20 + $0x10] sm:$0xff]   ;;  %v1057_v50 = vunpack.c.l.bf16 %v1074_v40  ;;  %v1058_v51 = vunpack.c.h.bf16 %v1074_v40  ;;  %v1045_v52 = vunpack.c.l.bf16 %v1071_v41  ;;  %s2415_s2 = sld [smem:[#allocation23_spill]] }
 0x1c2   : > { %v477_v29 = vmul.f32 1.442695, %v1016_v28  ;;  %v1076_v48 = vld [vmem:[%s2106_s20 + $0x30] sm:$0xff]   ;;  %v1073_v53 = vld [vmem:[%s2106_s20 + $0x18] sm:$0xff]   ;;  %v1046_v55 = vunpack.c.h.bf16 %v1071_v41  ;;  %v1061_v56 = vunpack.c.l.bf16 %v1075_v43  ;;  %v1062_v57 = vunpack.c.h.bf16 %v1075_v43  ;;  %v554_v40 = vld [vmem:[#allocation2 + $0x48] sm:$0xff] }
 0x1c3   : > { %1097 = vmatpush3.bf16.msra.mxu0 %v1346_v24  ;;  %1135 = vmatpush3.bf16.msra.mxu1 %v1346_v24  ;;  %v1077_v54 = vld [vmem:[%s2106_s20 + $0x38] sm:$0xff]   ;;  %v1049_v58 = vunpack.c.l.bf16 %v1072_v44  ;;  %v1050_v60 = vunpack.c.h.bf16 %v1072_v44  ;;  %v1065_v61 = vunpack.c.l.bf16 %v1076_v48  ;;  %v1066_v62 = vunpack.c.h.bf16 %v1076_v48  ;;  %v547_v27 = vld [vmem:[#allocation2 + $0x10] sm:$0xff] }
 0x1c4   : > { %1098 = vmatprep.subr.bf16.mxu0 %v1347_v25  ;;  %1128 = vmatprep.subr.bf16.mxu1 %v1347_v25  ;;  %1353 = vpow2.f32 %v477_v29  ;;  %v1053_v63 = vunpack.c.l.bf16 %v1073_v53  ;;  %v1054_v0 = vunpack.c.h.bf16 %v1073_v53  ;;  %v1069_v1 = vunpack.c.l.bf16 %v1077_v54  ;;  %v555_v28 = vld [vmem:[#allocation2 + $0x50] sm:$0xff]  ;;  %v545_v29 = vld [vmem:[#allocation2] sm:$0xff] }
 0x1c5   : > { %v1070_v2 = vunpack.c.h.bf16 %v1077_v54  ;;  %v549_v53 = vld [vmem:[#allocation2 + $0x20] sm:$0xff] }
 0x1c6   : > { %v557_v54 = vld [vmem:[#allocation2 + $0x60] sm:$0xff] }
 0x1c7   : > { %1099 = vmatpush3.bf16.msra.mxu0 %v1347_v25  ;;  %1136 = vmatpush3.bf16.msra.mxu1 %v1347_v25  ;;  %p1025_p11 = scmp.ne.s32.totalorder %s2415_s2, 1 }
 0x1c8   : > { %1100 = vmatprep.subr.bf16.mxu0 %v1348_v26  ;;  %1129 = vmatprep.subr.bf16.mxu1 %v1348_v26 }
 0x1cb   : > { %1101 = vmatpush3.bf16.msra.mxu0 %v1348_v26  ;;  %1137 = vmatpush3.bf16.msra.mxu1 %v1348_v26 }
 0x1cc   : > { %1102 = vmatprep.subr.bf16.mxu0 %v1349_v30  ;;  %1130 = vmatprep.subr.bf16.mxu1 %v1349_v30 }
 0x1ce   : > { %v1354_v33 = vpop.eup %1353 }
 0x1cf   : > { %1103 = vmatpush3.bf16.msra.mxu0 %v1349_v30  ;;  %1138 = vmatpush3.bf16.msra.mxu1 %v1349_v30  ;;  %v479_v35 = vadd.f32 1.0, %v1354_v33  ;;  %v553_v30 = vld [vmem:[#allocation2 + $0x40] sm:$0xff]  ;;  %v548_v33 = vld [vmem:[#allocation2 + $0x18] sm:$0xff] }
 0x1d0   : > { %1104 = vmatprep.subr.bf16.mxu0 %v1350_v31  ;;  %1131 = vmatprep.subr.bf16.mxu1 %v1350_v31 }
 0x1d1   : > { %1355 = vrcp.f32 %v479_v35 }
 0x1d3   : > { %1105 = vmatpush3.bf16.msra.mxu0 %v1350_v31  ;;  %1139 = vmatpush3.bf16.msra.mxu1 %v1350_v31 }
 0x1d4   : > { %1106 = vmatprep.subr.bf16.mxu0 %v1351_v32  ;;  %1132 = vmatprep.subr.bf16.mxu1 %v1351_v32 }
 0x1d7   : > { %1107 = vmatpush3.bf16.msra.mxu0 %v1351_v32  ;;  %1140 = vmatpush3.bf16.msra.mxu1 %v1351_v32 }
 0x1d8   : > { %1108 = vmatprep.subr.bf16.mxu0 %v1352_v34  ;;  %1133 = vmatprep.subr.bf16.mxu1 %v1352_v34 }
 0x1db   : > { %1109 = vmatpush3.bf16.msra.mxu0 %v1352_v34  ;;  %1141 = vmatpush3.bf16.msra.mxu1 %v1352_v34  ;;  %v1356_v45 = vpop.eup %1355  ;;  %v556_v34 = vld [vmem:[#allocation2 + $0x58] sm:$0xff] }
 0x1dc   : > { %v482_v49 = vmul.f32 %v1356_v45, %v473_v39  ;;  %v546_v39 = vld [vmem:[#allocation2 + $0x8] sm:$0xff] }
 0x1de   : > { %v519_v59 = vrot.slane %v482_v49, %v518_v42 }
 0x1e0   : > { %v521_v3 = vmul.f32 %v1041_v46, %v519_v59  ;;  %v522_v4 = vmul.f32 %v1042_v47, %v519_v59  ;;  %v529_v5 = vmul.f32 %v1057_v50, %v519_v59  ;;  %v530_v6 = vmul.f32 %v1058_v51, %v519_v59  ;;  %v551_v51 = vld [vmem:[#allocation2 + $0x30] sm:$0xff] }
 0x1e1   : > { %v523_v7 = vmul.f32 %v1045_v52, %v519_v59  ;;  %v524_v8 = vmul.f32 %v1046_v55, %v519_v59  ;;  %v531_v9 = vmul.f32 %v1061_v56, %v519_v59  ;;  %v532_v10 = vmul.f32 %v1062_v57, %v519_v59  ;;  %v559_v52 = vld [vmem:[#allocation2 + $0x70] sm:$0xff]  ;;  %v552_v57 = vld [vmem:[#allocation2 + $0x38] sm:$0xff] }
 0x1e2   : > { %v537_v11 = vpack.c.bf16 %v522_v4, %v521_v3  ;;  %v541_v12 = vpack.c.bf16 %v530_v6, %v529_v5  ;;  %v525_v13 = vmul.f32 %v1049_v58, %v519_v59  ;;  %v526_v14 = vmul.f32 %v1050_v60, %v519_v59  ;;  %v560_v58 = vld [vmem:[#allocation2 + $0x78] sm:$0xff] }
 0x1e3   : > { %v538_v15 = vpack.c.bf16 %v524_v8, %v523_v7  ;;  %v542_v16 = vpack.c.bf16 %v532_v10, %v531_v9  ;;  %v533_v17 = vmul.f32 %v1065_v61, %v519_v59  ;;  %v534_v18 = vmul.f32 %v1066_v62, %v519_v59 }
 0x1e4   : > { %1110 = vmatprep.mubr.bf16.mxu0 %v537_v11  ;;  %1118 = vmatprep.mubr.bf16.mxu1 %v541_v12  ;;  %v539_v19 = vpack.c.bf16 %v526_v14, %v525_v13  ;;  %v527_v20 = vmul.f32 %v1053_v63, %v519_v59  ;;  %v528_v21 = vmul.f32 %v1054_v0, %v519_v59  ;;  %v550_v63 = vld [vmem:[#allocation2 + $0x28] sm:$0xff] }
 0x1e5   : > { %1111 = vmatmul.mubr.bf16.vlgmr.msra.gmra.mrb[0].mxu0 %v538_v15  ;;  %1119 = vmatmul.mubr.bf16.vlgmr.msra.gmra.mrb[0].mxu1 %v542_v16  ;;  %v543_v22 = vpack.c.bf16 %v534_v18, %v533_v17  ;;  %v535_v23 = vmul.f32 %v1069_v1, %v519_v59  ;;  %v536_v24 = vmul.f32 %v1070_v2, %v519_v59  ;;  %v558_v0 = vld [vmem:[#allocation2 + $0x68] sm:$0xff] }
 0x1e6   : > { %1114 = vmatprep.mubr.bf16.mxu0 %v539_v19  ;;  %v540_v25 = vpack.c.bf16 %v528_v21, %v527_v20 }
 0x1e7   : > { %1122 = vmatprep.mubr.bf16.mxu1 %v543_v22  ;;  %v544_v26 = vpack.c.bf16 %v536_v24, %v535_v23 }
 0x1ed   : > { %1115 = vmatmul.mubr.bf16.gmra.mrb[4].mxu0 %v540_v25  ;;  %1123 = vmatmul.mubr.bf16.gmra.mrb[4].mxu1 %v544_v26 }
 0x2b8   : > { %v1112_v31 = vpop.f32.mrb[0].mxu0  ;;  %v1120_v32 = vpop.f32.mrb[0].mxu1 }
 0x2b9   : > { %v724_v35 = vadd.f32 %v1112_v31, %v547_v27  ;;  %v732_v36 = vadd.f32 %v1120_v32, %v555_v28  ;;  %v659_v37 = vpop.f32.mrb[1].mxu0  ;;  %v691_v38 = vpop.f32.mrb[1].mxu1 }
 0x2ba   : > { %v722_v41 = vadd.f32 %v659_v37, %v545_v29  ;;  %v730_v42 = vadd.f32 %v691_v38, %v553_v30  ;;  %v1113_v43 = vpop.f32.mrb[2].mxu0  ;;  %v1121_v44 = vpop.f32.mrb[2].mxu1 }
 0x2bb   : > { %740 = vst [vmem:[#allocation2 + $0x10] sm:$0xff] %v724_v35  ;;  %748 = vst [vmem:[#allocation2 + $0x50] sm:$0xff] %v732_v36  ;;  %v725_v45 = vadd.f32 %v1113_v43, %v548_v33  ;;  %v733_v46 = vadd.f32 %v1121_v44, %v556_v34  ;;  %v662_v47 = vpop.f32.mrb[3].mxu0  ;;  %v694_v48 = vpop.f32.mrb[3].mxu1 }
 0x2bc   : > { %738 = vst [vmem:[#allocation2] sm:$0xff] %v722_v41  ;;  %746 = vst [vmem:[#allocation2 + $0x40] sm:$0xff] %v730_v42  ;;  %v723_v49 = vadd.f32 %v662_v47, %v546_v39  ;;  %v731_v50 = vadd.f32 %v694_v48, %v554_v40 }
 0x2bd   : > { %741 = vst [vmem:[#allocation2 + $0x18] sm:$0xff] %v725_v45  ;;  %749 = vst [vmem:[#allocation2 + $0x58] sm:$0xff] %v733_v46 }
 0x2be   : > { %739 = vst [vmem:[#allocation2 + $0x8] sm:$0xff] %v723_v49  ;;  %747 = vst [vmem:[#allocation2 + $0x48] sm:$0xff] %v731_v50 }
 0x2c0   : > { %v1116_v55 = vpop.f32.mrb[4].mxu0  ;;  %v1124_v56 = vpop.f32.mrb[4].mxu1  ;;  %757 = sbr.rel (%p1025_p11) target bundleno = 720 (0x2d0), region = 60 }
 0x2c1   : > { %v728_v59 = vadd.f32 %v1116_v55, %v551_v51  ;;  %v736_v60 = vadd.f32 %v1124_v56, %v559_v52  ;;  %v675_v61 = vpop.f32.mrb[5].mxu0  ;;  %v707_v62 = vpop.f32.mrb[5].mxu1 }
 0x2c2   : > { %v726_v1 = vadd.f32 %v675_v61, %v549_v53  ;;  %v734_v2 = vadd.f32 %v707_v62, %v557_v54  ;;  %v1117_v3 = vpop.f32.mrb[6].mxu0  ;;  %v1125_v4 = vpop.f32.mrb[6].mxu1  ;;  %v760_v13 = vld [vmem:[#allocation2 + $0x10] sm:$0xff] (!%p1025_p11) }
 0x2c3   : > { %744 = vst [vmem:[#allocation2 + $0x30] sm:$0xff] %v728_v59  ;;  %752 = vst [vmem:[#allocation2 + $0x70] sm:$0xff] %v736_v60  ;;  %v729_v5 = vadd.f32 %v1117_v3, %v552_v57  ;;  %v737_v6 = vadd.f32 %v1125_v4, %v560_v58  ;;  %v678_v7 = vpop.f32.mrb[7].mxu0  ;;  %v710_v8 = vpop.f32.mrb[7].mxu1  ;;  %v758_v11 = vld [vmem:[#allocation2] sm:$0xff] (!%p1025_p11)  ;;  %v768_v21 = vld [vmem:[#allocation2 + $0x50] sm:$0xff] (!%p1025_p11) }
 0x2c4   : > { %742 = vst [vmem:[#allocation2 + $0x20] sm:$0xff] %v726_v1  ;;  %750 = vst [vmem:[#allocation2 + $0x60] sm:$0xff] %v734_v2  ;;  %v727_v9 = vadd.f32 %v678_v7, %v550_v63  ;;  %v735_v10 = vadd.f32 %v710_v8, %v558_v0  ;;  %v761_v14 = vld [vmem:[#allocation2 + $0x18] sm:$0xff] (!%p1025_p11)  ;;  %v766_v19 = vld [vmem:[#allocation2 + $0x40] sm:$0xff] (!%p1025_p11) }
 0x2c5   : > { %745 = vst [vmem:[#allocation2 + $0x38] sm:$0xff] %v729_v5  ;;  %753 = vst [vmem:[#allocation2 + $0x78] sm:$0xff] %v737_v6  ;;  %v759_v12 = vld [vmem:[#allocation2 + $0x8] sm:$0xff] (!%p1025_p11)  ;;  %v769_v22 = vld [vmem:[#allocation2 + $0x58] sm:$0xff] (!%p1025_p11) }
 0x2c6   : > { %743 = vst [vmem:[#allocation2 + $0x28] sm:$0xff] %v727_v9  ;;  %751 = vst [vmem:[#allocation2 + $0x68] sm:$0xff] %v735_v10  ;;  %v767_v20 = vld [vmem:[#allocation2 + $0x48] sm:$0xff] (!%p1025_p11) }
 0x2c7   : > { %774 = vst [vmem:[%s2130_s13] sm:$0xff] %v758_v11  ;;  %775 = vst [vmem:[%s2130_s13 + $0x8] sm:$0xff] %v759_v12 }
 0x2c8   : > { %776 = vst [vmem:[%s2130_s13 + $0x10] sm:$0xff] %v760_v13  ;;  %777 = vst [vmem:[%s2130_s13 + $0x18] sm:$0xff] %v761_v14 }
 0x2c9   : > { %782 = vst [vmem:[%s2130_s13 + $0x40] sm:$0xff] %v766_v19  ;;  %783 = vst [vmem:[%s2130_s13 + $0x48] sm:$0xff] %v767_v20 }
 0x2ca   : > { %v764_v17 = vld [vmem:[#allocation2 + $0x30] sm:$0xff]  ;;  %784 = vst [vmem:[%s2130_s13 + $0x50] sm:$0xff] %v768_v21  ;;  %785 = vst [vmem:[%s2130_s13 + $0x58] sm:$0xff] %v769_v22 }
 0x2cb   : > { %v762_v15 = vld [vmem:[#allocation2 + $0x20] sm:$0xff]  ;;  %780 = vst [vmem:[%s2130_s13 + $0x30] sm:$0xff] %v764_v17  ;;  %v772_v25 = vld [vmem:[#allocation2 + $0x70] sm:$0xff] }
 0x2cc   : > { %778 = vst [vmem:[%s2130_s13 + $0x20] sm:$0xff] %v762_v15  ;;  %v765_v18 = vld [vmem:[#allocation2 + $0x38] sm:$0xff]  ;;  %v770_v23 = vld [vmem:[#allocation2 + $0x60] sm:$0xff]  ;;  %788 = vst [vmem:[%s2130_s13 + $0x70] sm:$0xff] %v772_v25 }
 0x2cd   : > { %v763_v16 = vld [vmem:[#allocation2 + $0x28] sm:$0xff]  ;;  %781 = vst [vmem:[%s2130_s13 + $0x38] sm:$0xff] %v765_v18  ;;  %786 = vst [vmem:[%s2130_s13 + $0x60] sm:$0xff] %v770_v23  ;;  %v773_v26 = vld [vmem:[#allocation2 + $0x78] sm:$0xff] }
 0x2ce   : > { %779 = vst [vmem:[%s2130_s13 + $0x28] sm:$0xff] %v763_v16  ;;  %v771_v24 = vld [vmem:[#allocation2 + $0x68] sm:$0xff]  ;;  %789 = vst [vmem:[%s2130_s13 + $0x78] sm:$0xff] %v773_v26 }
 0x2cf   : > { %787 = vst [vmem:[%s2130_s13 + $0x68] sm:$0xff] %v771_v24 }
 0x2d0 PF: > { %s2416_s20 = sld [smem:[#allocation25_spill]]  ;;  %s2417_s10 = sld [smem:[#allocation24_spill]] }
 0x2d1   : > { %s2418_s24 = sld [smem:[#allocation32_spill]]  ;;  %s806_s12 = sshll.u32 %s2130_s13, 4  ;;  %s2178_s12 = int_to_ptr.vmem [resolvable:$true] %s806_s12 }
 0x2d2   : > { %s2419_s8 = sld [smem:[#allocation40_spill]]  ;;  %s2187_s21 = scalar_lea.sflag [#allocation5], %s398_s23 }
 0x2d3   : > { %s1447_s1 = scalar_lea.vmem %s2178_s12, 2048  ;;  %s1696_s13 = smov [#allocation10]  }
 0x2d4   : > { %p1448_p0 = scmp.ne.s32.totalorder %s2178_s12, %s1447_s1  ;;  %s1451_s16 = sshll.u32 %s1696_s13, 4  ;;  %s1452_s16 = int_to_ptr.vmem [resolvable:$false] %s1451_s16 }
 0x2d5   : > { %s1453_s2 = scalar_lea.vmem %s1452_s16, 4096  ;;  %p1454_p3 = scmp.lt.s32.totalorder %s2178_s12, %s1452_s16 }
 0x2d6   : > { %s1038_s17 = sshll.u32 %s2416_s20, 5  ;;  %p1455_p7 = scmp.lt.s32.totalorder %s1453_s2, %s1447_s1 }
 0x2d7   : > { %s803_s0 = sadd.s32 %s2417_s10, %s1038_s17  ;;  %p2421_p8 = scmp.ne.s32.totalorder %s2418_s24, 0 }
 0x2d8   : > { %s1029_s27 = sshll.u32 %s803_s0, 7  ;;  %s2420_s3 = smov %s2419_s8 }
 0x2d9   : > { %s2183_s7 = scalar_lea.hbm %s2419_s8, %s1029_s27  ;;  %p1449_p13 = pnand %p1448_p0, %p2421_p8 }
 0x2da   : > { %p1456_p10 = por %p1455_p7, %p1454_p3 }
 0x2db   : > { %p1450_p4 = pneg %p1449_p13 }
 0x2dd   : > { %p1457_p1 = pnand %p1456_p10, %p1450_p4 }
 0x2df   : > { %1460 = shalt.err (!%p1457_p1)
}
 0x2e0   : > { %s1461_s23 = scalar_lea.hbm %s2183_s7, 2048  ;;  %s1465_s17 = scalar_lea.hbm %s2420_s3, 8192 }
 0x2e1   : > { %p1462_p5 = scmp.ne.s32.totalorder %s2183_s7, %s1461_s23  ;;  %p1466_p2 = scmp.lt.u32.totalorder %s2183_s7, %s2420_s3 }
 0x2e2   : > { %p1467_p9 = scmp.lt.u32.totalorder %s1465_s17, %s1461_s23  ;;  %p1469_p0 = scmp.lt.u32.totalorder %s1461_s23, %s2183_s7 }
 0x2e3   : > { %p1463_p6 = pnand %p1462_p5, %p2421_p8 }
 0x2e4   : > { %p1468_p11 = por %p1467_p9, %p1466_p2 }
 0x2e5   : > { %p1464_p12 = pneg %p1463_p6 }
 0x2e6   : > { %p1470_p13 = por %p1469_p0, %p1468_p11 }
 0x2e8   : > { %p1471_p4 = pnand %p1470_p13, %p1464_p12 }
 0x2ea   : > { %1474 = shalt.err (!%p1471_p4)
}
 0x2eb   : > { %s1697_s6 = smov 128   ;;  %s1698_s30 = smov 256  }
 0x2ec   : > { %s1699_s8 = smov 8   ;;  %s1700_s1 = smov [#allocation11]  }
 0x2ed   : > { %1150 = dma.vmem_to_hbm [thread:$0]  (%p2421_p8), %s2178_s12, 2048, %s2183_s7, %s2187_s21, %s1697_s6, %s1698_s30, %s1699_s8  }
 0x2ee   : > { %s820_s13 = sshll.u32 %s1700_s1, 4  ;;  %p2422_p7 = scmp.eq.s32.totalorder %s1902_s22, 7  ;;  %s821_s13 = int_to_ptr.vmem [resolvable:$true] %s820_s13 }
 0x2ef   : > { %s1475_s16 = scalar_lea.vmem %s821_s13, 32  ;;  %p1482_p5 = scmp.lt.s32.totalorder %s821_s13, %s821_s13 }
 0x2f0   : > { %p1476_p3 = scmp.ne.s32.totalorder %s821_s13, %s1475_s16  ;;  %p1483_p6 = scmp.lt.s32.totalorder %s1475_s16, %s1475_s16 }
 0x2f2   : > { %p1477_p10 = pnand %p1476_p3, %p2422_p7  ;;  %p1484_p12 = por %p1483_p6, %p1482_p5 }
 0x2f4   : > { %p1478_p1 = pneg %p1477_p10 }
 0x2f6   : > { %p1485_p2 = pnand %p1484_p12, %p1478_p1 }
 0x2f8   : > { %1488 = shalt.err (!%p1485_p2)
}
 0x2f9   : > { %s2423_s20 = sld [smem:[#allocation41_spill]]  ;;  %p2424_p9 = pmov %p2422_p7 }
 0x2ff   : > { %s1489_s10 = scalar_lea.hbm %s2423_s20, 32 }
 0x300   : > { %p1490_p8 = scmp.ne.s32.totalorder %s2423_s20, %s1489_s10  ;;  %p1495_p13 = scmp.lt.u32.totalorder %s1489_s10, %s2423_s20 }
 0x302   : > { %p1491_p11 = pnand %p1490_p8, %p2424_p9 }
 0x304   : > { %p1492_p0 = pneg %p1491_p11 }
 0x306   : > { %p1497_p4 = pnand %p1495_p13, %p1492_p0 }
 0x308   : > { %1500 = shalt.err (!%p1497_p4)
}
 0x309   : > { %p2425_p3 = pmov %p2422_p7  ;;  %s2426_s30 = sld [smem:[#allocation42_spill]] }
 0x30b   : > { %1152 = dma.vmem_to_hbm [thread:$0]  (%p2425_p3), %s821_s13, 32, %s2423_s20, [#allocation12]  }
 0x30c   : > { %p2428_p10 = pmov %p2425_p3 }
 0x30f   : > { %s2427_s1 = smov %s2426_s30  ;;  %s1501_s8 = scalar_lea.hbm %s2426_s30, 16 }
 0x310   : > { %p1502_p7 = scmp.ne.s32.totalorder %s2427_s1, %s1501_s8  ;;  %p1507_p6 = scmp.lt.u32.totalorder %s1501_s8, %s2427_s1 }
 0x312   : > { %p1503_p1 = pnand %p1502_p7, %p2428_p10 }
 0x314   : > { %p1504_p5 = pneg %p1503_p1 }
 0x316   : > { %p1509_p12 = pnand %p1507_p6, %p1504_p5 }
 0x318   : > { %1512 = shalt.err (!%p1509_p12)
}
 0x319   : > { %s1701_s24 = smov [#allocation13]   ;;  %p2429_p2 = pmov %p2425_p3 }
 0x31b   : > { %1154 = dma.smem_to_hbm (%p2429_p2), %s1701_s24, 16, %s2427_s1, [#allocation6]  }
 0x31c   : > { %p2430_p8 = pmov %p2429_p2 }
 0x31d   : > { %p2431_p9 = pmov %p2429_p2 }
 0x31e   : > { %1602 = dma.done.wait (%p2430_p8), [#allocation12], 32  }
 0x31f   : > { %1604 = vsyncadd (%p2431_p9), [#allocation12], 4294967264  ;;  %p2432_p11 = pmov %p2429_p2 }
 0x320   : > { %p2433_p0 = pmov %p2429_p2 }
 0x321   : > { %1606 = dma.done.wait (%p2432_p11), [#allocation6], 16  }
 0x322   : > { %1608 = vsyncadd (%p2433_p0), [#allocation6], 4294967280 }
 0x323   : > { %841 = sfence }
 0x324 PF: > { %s2434_s7 = sld [smem:[#allocation20_spill]]  ;;  %s2435_s21 = sld [smem:[#allocation33_spill]] }
 0x325   : > { %p1179_p13 = scmp.ge.s32.totalorder %s1687_s19, 2 }
 0x32a   : > { %s850_s17 = sand.u32 1, %s2434_s7   ;;  %p2436_p4 = scmp.ne.s32.totalorder %s2435_s21, 0 }
 0x32b   : > { %s851_s0 = scalar_lea.sflag [#allocation5], %s850_s17 }
 0x32c   : > { %p1171_p3 = pnand %p1179_p13, %p2436_p4 }
 0x32e   : > { %1610 = dma.done.wait (!%p1171_p3), %s851_s0, 2048  }
 0x32f   : > { %1612 = vsyncadd (!%p1171_p3), %s851_s0, 4294965248  ;;  %s29_s19 = sadd.s32 1, %s1687_s19   ;;  %s2439_s30 = sld [smem:[#allocation21_spill]] }
 0x330   : > { %p2258_p7 = scmp.ge.s32.totalorder %s29_s19, 10   ;;  %s2440_s22 = sld [smem:[#allocation22_spill]] }
 0x331   : > { %s2441_s12 = sld [smem:[#allocation31_spill]]  ;;  %s2442_s13 = sld [smem:[#allocation26_spill]] }
 0x332   : > { %s2443_s16 = sld [smem:[#allocation27_spill]]  ;;  %s2444_s2 = sld [smem:[#allocation28_spill]] }
 0x333   : > { %s2445_s24 = smov %s1619_s25  ;;  %s2446_s17 = sld [smem:[#allocation34_spill]] }
 0x334   : > { %s2447_s25 = smov %s1623_s26  ;;  %s2448_s23 = sld [smem:[#allocation35_spill]] }
 0x335   : > { %s2449_s26 = smov %s2054_s5  ;;  %s2450_s27 = smov %s1631_s28 }
 0x336   : > { %s2451_s28 = smov %s1635_s29  ;;  %s2452_s29 = smov %s2036_s14 }
 0x337   : > { %s2453_s8 = smov %s1647_s9  ;;  %s2454_s9 = smov %s2049_s15 }
 0x338   : > { %s2455_s10 = smov %s1655_s11  ;;  %s2456_s11 = smov %s2440_s22 }
 0x339   : > { %s2457_s14 = smov %s2443_s16  ;;  %s2458_s15 = smov %s1683_s18 }
 0x33a   : > { %s2459_s16 = smov %s2444_s2  ;;  %s2460_s18 = smov %s2448_s23 }
 0x33b   :  { %28 = sbr.rel (!%p2258_p7) target bundleno = 25 (0x19), region = 138 }
 0x342   :  { %856 = vsyncpa [#allocation4], 1 }
 0x343   :  { %858 = vsyncpa [#allocation4 + $0x1], 1 }
 0x344   :  { %859 = vsyncpa [#allocation8], 1 }
 0x345   :  { %861 = vsyncpa [#allocation8 + $0x1], 1 }
 0x346   :  { %862 = vsyncpa [#allocation5], 1 }
 0x347   :  { %864 = vsyncpa [#allocation5 + $0x1], 1 }
 0x348   :  { %865 = vsyncpa [#allocation12], 1 }
 0x349   :  { %866 = vsyncpa [#allocation6], 1 }
 0x34a   :  { %868 = vsyncpa [#allocation6 + $0x1], 1 }

</bundles_post_ra>
